<compile_context>
chip_gen: v5e
topology: v5e:2x2
jax: 0.10.0
libtpu: 0.0.40
codegen_flags: <defaults>
</compile_context>

<pallas_src>
import jax
import jax.numpy as jnp
from jax.experimental import pallas as pl
from jax.experimental.pallas import tpu as pltpu


_LANES = 128
_SUBLANES = 8
_NUM_CORES = 2                        # megacore split; sequential on 1-TC chips
_TILE_BYTES = 12 * 1024 * 1024        # per-buffer VMEM budget (x2 double buffer)
_VMEM_LIMIT = 40 * 1024 * 1024        # fits v7x's 64 MiB per-core VMEM with headroom


def _make_sum_log1p_kernel(tile_rows, tiles_per_core, num_tiles, last_rows):
    """Builds a kernel that accumulates sum(log(x+1)) into an (8,128) block."""
    full_last = (last_rows == tile_rows)
    has_overhang = (_NUM_CORES * tiles_per_core != num_tiles)

    def kernel(x_ref, o_ref):
        c = pl.program_id(0)                      # core (parallel) index
        j = pl.program_id(1)                      # per-core tile index
        t = c * tiles_per_core + j                # global tile index

        @pl.when(j == 0)
        def _init():
            o_ref[...] = jnp.zeros_like(o_ref)

        def accumulate(rows):
            # `rows` is static and a multiple of 8; slice keeps garbage rows
            # of a partial block out of the transcendental and the sum.
            x = x_ref[:rows, :].astype(jnp.float32)
            lx = jnp.log(x + 1.0)
            o_ref[...] += jnp.sum(
                lx.reshape(rows // _SUBLANES, _SUBLANES, _LANES), axis=0)

        if full_last:
            if has_overhang:
                # Only the second core's single overhang tile is skipped.
                @pl.when(t < num_tiles)
                def _steady():
                    accumulate(tile_rows)
            else:
                accumulate(tile_rows)
        else:
            # Steady-state tiles: no masking / slicing on the hot path.
            @pl.when(t < num_tiles - 1)
            def _steady():
                accumulate(tile_rows)

            # Single partial last tile: statically sized valid-row slice.
            # Overhang tiles (t >= num_tiles) fall through both branches.
            @pl.when(t == num_tiles - 1)
            def _last():
                accumulate(last_rows)

    return kernel


def _sum_log1p(x):
    """sum(log(x + 1)) over every element of x via a streaming Pallas kernel."""
    flat = jnp.reshape(x, (-1,))
    n = flat.shape[0]
    # Pad the flattened stream to a multiple of 8*128 = 1024 elements with
    # zeros (log(0+1) == 0 contributes nothing to the sum).  For typical
    # shapes pad == 0 and the reshapes below are free metadata changes.
    pad = (-n) % (_SUBLANES * _LANES)
    if pad:
        flat = jnp.pad(flat, (0, pad))
    arr = flat.reshape(-1, _LANES)                # lane-dense (R, 128), R % 8 == 0
    rows = arr.shape[0]

    itemsize = jnp.dtype(arr.dtype).itemsize
    budget_rows = max(
        _SUBLANES,
        (_TILE_BYTES // (_LANES * itemsize)) // _SUBLANES * _SUBLANES)
    # Round per-core share up so the two cores get balanced tiles.
    per_core_rows = pl.cdiv(pl.cdiv(rows, _NUM_CORES), _SUBLANES) * _SUBLANES
    tile_rows = min(rows, budget_rows, per_core_rows)

    num_tiles = pl.cdiv(rows, tile_rows)
    tiles_per_core = pl.cdiv(num_tiles, _NUM_CORES)
    last_rows = rows - (num_tiles - 1) * tile_rows

    kernel = _make_sum_log1p_kernel(tile_rows, tiles_per_core, num_tiles,
                                    last_rows)

    n_elems = rows * _LANES
    cost = pl.CostEstimate(
        flops=2 * n_elems,
        transcendentals=n_elems,
        bytes_accessed=n_elems * itemsize + _NUM_CORES * _SUBLANES * _LANES * 4,
    )

    partials = pl.pallas_call(
        kernel,
        out_shape=jax.ShapeDtypeStruct((_NUM_CORES * _SUBLANES, _LANES),
                                       jnp.float32),
        grid_spec=pltpu.PrefetchScalarGridSpec(
            num_scalar_prefetch=0,
            grid=(_NUM_CORES, tiles_per_core),
            in_specs=[pl.BlockSpec(
                (tile_rows, _LANES),
                lambda c, j: (jnp.minimum(c * tiles_per_core + j,
                                          num_tiles - 1), 0))],
            # Output block doubles as the per-core accumulator (same block
            # index across the "arbitrary" axis).
            out_specs=pl.BlockSpec((_SUBLANES, _LANES), lambda c, j: (c, 0)),
        ),
        compiler_params=pltpu.CompilerParams(
            dimension_semantics=("parallel", "arbitrary"),
            vmem_limit_bytes=_VMEM_LIMIT,
        ),
        cost_estimate=cost,
    )(arr)
    return jnp.sum(partials)


def mutual_loss(global_vector, infered_vector):
    """-sigmoid(H_global + H_local - H_joint), matching the PyTorch module."""
    assert global_vector.ndim == 2 and infered_vector.ndim == 2
    assert global_vector.shape[0] == infered_vector.shape[0]
    n_g = global_vector.size
    n_i = infered_vector.size

    sum_g = _sum_log1p(global_vector)
    sum_i = _sum_log1p(infered_vector)

    entropy_global = -sum_g / n_g
    entropy_local = -sum_i / n_i
    # joint = cat([g, x], dim=1): mean over (n_g + n_i) elements.
    entropy_joint = -(sum_g + sum_i) / (n_g + n_i)
    mutual_info = entropy_global + entropy_local - entropy_joint
    return -jax.nn.sigmoid(mutual_info)


def _reference(global_vector, infered_vector):
    joint = jnp.concatenate((global_vector, infered_vector), axis=1)
    ej = -jnp.mean(jnp.log(joint + 1.0))
    eg = -jnp.mean(jnp.log(global_vector + 1.0))
    el = -jnp.mean(jnp.log(infered_vector + 1.0))
    mi = eg + el - ej
    return -jax.nn.sigmoid(mi)


if __name__ == "__main__":
    key = jax.random.PRNGKey(0)
    kg, ki = jax.random.split(key)

    # Small shapes consistent with the module's (batch, feature) inputs.
    # Non-negative activations so log(x+1) is well defined.
    B, D1, D2 = 2, 32, 32
    global_vector = jax.random.uniform(kg, (B, D1), dtype=jnp.float32)
    infered_vector = jax.random.uniform(ki, (B, D2), dtype=jnp.float32)

    result = mutual_loss(global_vector, infered_vector)
    jax.block_until_ready(result)
    ref = _reference(global_vector, infered_vector)
    assert jnp.allclose(result, ref, atol=1e-5, rtol=1e-5), (result, ref)

    # Exercise the multi-tile / megacore / partial-last-tile path.
    kg2, ki2 = jax.random.split(jax.random.PRNGKey(0))
    B2, D = 2056, 128
    g2 = jax.random.uniform(kg2, (B2, D), dtype=jnp.float32)
    x2 = jax.random.uniform(ki2, (B2, D), dtype=jnp.float32)
    r2 = mutual_loss(g2, x2)
    jax.block_until_ready(r2)
    ref2 = _reference(g2, x2)
    assert jnp.allclose(r2, ref2, atol=1e-4, rtol=1e-4), (r2, ref2)

    print("KERNEL_OK")
</pallas_src>

<mosaic_0001>
module attributes {stable_mosaic.version = 11 : i64} {
  func.func @kernel(%arg0: i32, %arg1: i32, %arg2: memref<8x128xf32, #tpu.memory_space<vmem>>, %arg3: memref<8x128xf32, #tpu.memory_space<vmem>>) attributes {dimension_semantics = [#tpu.dimension_semantics<parallel>, #tpu.dimension_semantics<arbitrary>], iteration_bounds = array<i64: 2, 1>, scalar_prefetch = 0 : i64, scratch_operands = 0 : i64, tpu.core_type = #tpu.core_type<tc>, window_params = [{transform_indices = @transform_0, window_bounds = array<i64: 8, 128>}, {transform_indices = @transform_1, window_bounds = array<i64: 8, 128>}]} {
    %c1_i32 = arith.constant 1 : i32
    %0 = arith.muli %arg0, %c1_i32 : i32
    %1 = arith.addi %0, %arg1 : i32
    %c0_i32 = arith.constant 0 : i32
    %2 = arith.cmpi eq, %arg1, %c0_i32 : i32
    %3 = arith.extui %2 : i1 to i32
    %c0_i32_0 = arith.constant 0 : i32
    %4 = arith.cmpi ne, %3, %c0_i32_0 : i32
    scf.if %4 {
      %cst = arith.constant 0.000000e+00 : f32
      %8 = vector.broadcast %cst : f32 to vector<8x128xf32>
      %c0 = arith.constant 0 : index
      %c0_3 = arith.constant 0 : index
      %9 = vector.load %arg3[%c0, %c0_3] : memref<8x128xf32, #tpu.memory_space<vmem>>, vector<8x128xf32>
      tpu.vector_store %arg3[%c0, %c0_3], %8 {strides = array<i32>} : memref<8x128xf32, #tpu.memory_space<vmem>>, vector<8x128xf32>,
    } else {
    }
    %c1_i32_1 = arith.constant 1 : i32
    %5 = arith.cmpi slt, %1, %c1_i32_1 : i32
    %6 = arith.extui %5 : i1 to i32
    %c0_i32_2 = arith.constant 0 : i32
    %7 = arith.cmpi ne, %6, %c0_i32_2 : i32
    scf.if %7 {
      %c0 = arith.constant 0 : index
      %c0_3 = arith.constant 0 : index
      %8 = vector.load %arg2[%c0, %c0_3] : memref<8x128xf32, #tpu.memory_space<vmem>>, vector<8x128xf32>
      %cst = arith.constant 1.000000e+00 : f32
      %9 = vector.broadcast %cst : f32 to vector<8x128xf32>
      %10 = arith.addf %8, %9 : vector<8x128xf32>
      %11 = math.log %10 : vector<8x128xf32>
      %c0_4 = arith.constant 0 : index
      %c0_5 = arith.constant 0 : index
      %12 = vector.load %arg3[%c0_4, %c0_5] : memref<8x128xf32, #tpu.memory_space<vmem>>, vector<8x128xf32>
      %13 = vector.shape_cast %11 : vector<8x128xf32> to vector<1x8x128xf32>
      %cst_6 = arith.constant dense<0.000000e+00> : vector<8x128xf32>
      %14 = vector.multi_reduction <add>, %13, %cst_6 [0] : vector<1x8x128xf32> to vector<8x128xf32>
      %15 = arith.addf %12, %14 : vector<8x128xf32>
      %c0_7 = arith.constant 0 : index
      %c0_8 = arith.constant 0 : index
      %16 = vector.load %arg3[%c0_7, %c0_8] : memref<8x128xf32, #tpu.memory_space<vmem>>, vector<8x128xf32>
      tpu.vector_store %arg3[%c0_7, %c0_8], %15 {strides = array<i32>} : memref<8x128xf32, #tpu.memory_space<vmem>>, vector<8x128xf32>,
    } else {
    }
    return
  }
  func.func @transform_0(%arg0: i32, %arg1: i32) -> (i32, i32) {
    %c1_i32 = arith.constant 1 : i32
    %0 = arith.muli %arg0, %c1_i32 : i32
    %1 = arith.addi %0, %arg1 : i32
    %c0_i32 = arith.constant 0 : i32
    %2 = arith.minsi %1, %c0_i32 : i32
    %c0_i32_0 = arith.constant 0 : i32
    %c0_i32_1 = arith.constant 0 : i32
    return %2, %c0_i32_0 : i32, i32
  }
  func.func @transform_1(%arg0: i32, %arg1: i32) -> (i32, i32) {
    %c0_i32 = arith.constant 0 : i32
    %c0_i32_0 = arith.constant 0 : i32
    return %arg0, %c0_i32 : i32, i32
  }
}

</mosaic_0001>

<bundles_post_ra>
// kernel: tpu_custom_call.1
= control target key start
LH: loop header
LB: loop body
LE: loop exit
PB: predicated region body
PF: predicated region fallthrough
CT: control target
= control target key end

     0   :  { %6 = vsyncpa [#allocation3], 0  ;;  %s665_s0 = inlined_call_operand.hbm [shape: f32[8,128], index: 0, kind: input, shape index: {}]   ;;  %s666_s1 = inlined_call_operand.hbm [shape: f32[16,128], index: 1, kind: output, shape index: {}]  }
   0x1   :  { %8 = vsyncpa [#allocation3 + $0x1], 0 }
   0x2   :  { %9 = vsyncpa [#allocation4], 0 }
   0x3   :  { %11 = vsyncpa [#allocation4 + $0x1], 0  ;;  %s520_s6 = smov 0   ;;  %s522_s7 = smov 0  }
   0x4   :  { %s524_s8 = smov 0   ;;  %s526_s9 = smov 0  }
   0x5   :  { %s528_s10 = smov 0   ;;  %s530_s11 = smov 0  }
   0x6   :  { %s532_s12 = smov 0   ;;  %s534_s13 = smov 0  }
   0x7 LB: > { %s270_s14 = sadd.s32 4294967295, %s506_s13   ;;  %s271_s15 = sadd.s32 4294967294, %s506_s13   ;;  %s506_s13 = sphi %s534_s13, %s17_s13   ;;  %s502_s12 = sphi %s532_s12, %s677_s12   ;;  %s498_s11 = sphi %s530_s11, %s676_s11   ;;  %s494_s10 = sphi %s528_s10, %s655_s10   ;;  %s490_s9 = sphi %s526_s9, %s675_s9   ;;  %s486_s8 = sphi %s524_s8, %s674_s8   ;;  %s482_s7 = sphi %s522_s7, %s673_s7   ;;  %s478_s6 = sphi %s520_s6, %s672_s6  }
   0x8   : > { %s29_s16 = sadd.s32 1, %s502_s12  ;;  %p475_p1 = scmp.ne.s32.totalorder %s494_s10, 0 }
   0x9   : > { %p31_p0 = scmp.ge.s32.totalorder %s29_s16, 2  ;;  %p50_p2 = scmp.eq.s32.totalorder %s506_s13, 0 }
   0xa   : > { %p55_p3 = scmp.ne.s32.totalorder %s494_s10, %s490_s9  ;;  %p56_p5 = scmp.eq.s32.totalorder %s270_s14, 0 }
   0xb   : > { %s679_s16 = smov (%p31_p0, %s29_s16), 0  ;;  %p566_p4 = por %p475_p1, %p50_p2 }
   0xc   : > { %p570_p6 = por %p56_p5, %p55_p3  ;;  %s65_s19 = ssub.s32 %s502_s12, %s679_s16 }
   0xd   : > { %p66_p7 = scmp.eq.s32.totalorder %s65_s19, 0  ;;  %s68_s20 = sadd.s32 1, %s486_s8 }
   0xe   : > { %p78_p8 = scmp.ne.s32.totalorder %s486_s8, %s482_s7  ;;  %p79_p9 = scmp.eq.s32.totalorder %s270_s14, 1 }
   0xf   : > { %s578_s21 = scalar_select %p66_p7, %s486_s8, %s68_s20  }
  0x10   : > { %p84_p10 = scmp.ne.s32.totalorder %s482_s7, %s478_s6  ;;  %p85_p11 = scmp.eq.s32.totalorder %s271_s15, 1 }
  0x11   : > { %p584_p12 = por %p79_p9, %p78_p8  ;;  %p273_p13 = scmp.ge.s32.totalorder %s506_s13, 2 }
  0x12   : > { %p589_p0 = por %p85_p11, %p84_p10  ;;  %p296_p1 = scmp.lt.s32.totalorder %s506_s13, 2 }
  0x13   : > { %s118_s26 = sshll.u32 %s665_s0, 4  ;;  %s508_s27 = smov [#allocation2]   ;;  %s119_s26 = int_to_ptr.hbm [resolvable:$true] %s118_s26 }
  0x14   : > { %s120_s28 = sshll.u32 %s508_s27, 4  ;;  %p599_p2 = pnand %p296_p1, %p566_p4  ;;  %s121_s28 = int_to_ptr.vmem [resolvable:$true] %s120_s28 }
  0x15   : > { %p276_p3 = scmp.ge.s32.totalorder %s506_s13, 1  ;;  %p125_p5 = scmp.lt.s32.totalorder %s506_s13, 3 }
  0x16   : > { %s373_s30 = sshra.s32 %s119_s26, 4  ;;  %p377_p8 = pneg %p599_p2  ;;  %s374_s30 = int_to_ptr.hbm [resolvable:$true] %s373_s30 }
  0x17   : > { %s375_s2 = scalar_lea.hbm %s374_s30, 8  ;;  %s380_s5 = scalar_lea.hbm %s665_s0, 8 }
  0x18   : > { %p376_p7 = scmp.ne.s32.totalorder %s374_s30, %s375_s2  ;;  %p382_p11 = scmp.lt.s32.totalorder %s380_s5, %s375_s2 }
  0x1a   : > { %p378_p9 = pnand %p377_p8, %p376_p7 }
  0x1c   : > { %p379_p10 = pneg %p378_p9 }
  0x1e   : > { %p384_p4 = pnand %p382_p11, %p379_p10 }
  0x20   : > { %387 = shalt.err (!%p384_p4)
}
  0x21   : > { %291 = dma.hbm_to_vmem [thread:$0]  (!%p599_p2), %s119_s26, 128, %s121_s28, [#allocation3]  }
  0x22   : > { %p126_p1 = pnand %p276_p3, %p125_p5 }
  0x23   : > { %s131_s9 = sand.u32 (!%p126_p1), 1, %s494_s10  }
  0x24   : > { %129 = sbr.rel (%p126_p1) target bundleno = 79 (0x4f), region = 24  ;;  %s277_s14 = sshll.u32 (!%p126_p1), %s131_s9, 3 }
  0x25   : > { %s132_s15 = scalar_lea.sflag (!%p126_p1), [#allocation3], %s131_s9  ;;  %s135_s17 = scalar_lea.vmem (!%p126_p1), [#allocation2], %s277_s14 }
  0x29   : > { %468 = dma.done.wait (%p570_p6), %s132_s15, 128  }
  0x2a   : > { %470 = vsyncadd (%p570_p6), %s132_s15, 4294967168  ;;  %s152_s19 = sand.u32 1, %s482_s7   ;;  %v509_v0 = vmov 0.0   ;;  %p279_p2 = scmp.ge.s32.totalorder %s498_s11, 1 }
  0x2b   : > { %s278_s20 = sshll.u32 %s152_s19, 3 }
  0x2c   : > { %s154_s24 = scalar_lea.vmem [#allocation5], %s278_s20  ;;  %167 = sbr.rel (%p279_p2) target bundleno = 64 (0x40), region = 36 }
  0x2d   : > { %163 = vst [vmem:[%s154_s24] sm:$0xff] %v509_v0 }
  0x31   : > { %v168_v1 = vld [vmem:[%s135_s17] sm:$0xff] }
  0x32   : > { %v169_v2 = vadd.f32 1.0, %v168_v1 }
  0x34   : > { %371 = vlog2.f32 %v169_v2  ;;  %v172_v4 = vld [vmem:[%s154_s24] sm:$0xff] }
  0x3a   : > { %v372_v3 = vpop.eup %371 }
  0x3b   : > { %v171_v5 = vmul.f32 0.6931472, %v372_v3 }
  0x3d   : > { %v174_v6 = vadd.f32 %v172_v4, %v171_v5 }
  0x3f   : > { %175 = vst [vmem:[%s154_s24] sm:$0xff] %v174_v6 }
  0x40 PF: > { %s281_s18 = sshll.u32 %s498_s11, 3  ;;  %s189_s28 = sshll.u32 %s154_s24, 4  ;;  %s190_s28 = int_to_ptr.vmem [resolvable:$true] %s189_s28 }
  0x41   : > { %s187_s27 = scalar_lea.hbm %s666_s1, %s281_s18  ;;  %s177_s30 = scalar_lea.sflag [#allocation4], %s152_s19 }
  0x42   : > { %s191_s29 = sshll.u32 %s187_s27, 4  ;;  %s423_s11 = scalar_lea.hbm %s666_s1, 16  ;;  %s192_s29 = int_to_ptr.hbm [resolvable:$true] %s191_s29 }
  0x43   : > { %s417_s2 = sshra.s32 %s192_s29, 4  ;;  %s418_s2 = int_to_ptr.hbm [resolvable:$true] %s417_s2 }
  0x44   : > { %s419_s3 = scalar_lea.hbm %s418_s2, 8  ;;  %p424_p7 = scmp.lt.s32.totalorder %s418_s2, %s666_s1 }
  0x45   : > { %p420_p6 = scmp.ne.s32.totalorder %s418_s2, %s419_s3  ;;  %p425_p8 = scmp.lt.s32.totalorder %s423_s11, %s419_s3 }
  0x47   : > { %p421_p3 = pnand %p420_p6, %p584_p12  ;;  %p426_p9 = por %p425_p8, %p424_p7 }
  0x49   : > { %p422_p5 = pneg %p421_p3 }
  0x4b   : > { %p427_p10 = pnand %p426_p9, %p422_p5 }
  0x4d   : > { %430 = shalt.err (!%p427_p10)
}
  0x4e   : > { %286 = dma.vmem_to_hbm [thread:$0]  (%p584_p12), %s190_s28, 128, %s192_s29, %s177_s30  }
  0x4f PF: > { %s203_s15 = sand.u32 1, %s478_s6   ;;  %p293_p11 = pnand %p273_p13, %p589_p0 }
  0x50   : > { %s204_s17 = scalar_lea.sflag [#allocation4], %s203_s15 }
  0x51   : > { %p294_p4 = pneg %p293_p11 }
  0x53   : > { %472 = dma.done.wait (%p294_p4), %s204_s17, 128  }
  0x54   : > { %474 = vsyncadd (%p294_p4), %s204_s17, 4294967168  ;;  %s17_s13 = sadd.s32 1, %s506_s13   ;;  %s672_s6 = smov %s482_s7 }
  0x55   : > { %p14_p1 = scmp.ge.s32.totalorder %s17_s13, 4   ;;  %s673_s7 = smov %s486_s8 }
  0x56   : > { %s674_s8 = smov %s578_s21  ;;  %s675_s9 = smov %s494_s10 }
  0x57   : > { %s655_s10 = smov 0   ;;  %s676_s11 = smov %s502_s12 }
  0x58   : > { %s677_s12 = smov %s679_s16  ;;  %16 = sbr.rel (!%p14_p1) target bundleno = 7 (0x7), region = 77 }
  0x5d   :  { %210 = vsyncpa [#allocation3], 1 }
  0x5e   :  { %212 = vsyncpa [#allocation3 + $0x1], 1 }
  0x5f   :  { %213 = vsyncpa [#allocation4], 1 }
  0x60   :  { %215 = vsyncpa [#allocation4 + $0x1], 1 }

</bundles_post_ra>
